<compile_context>
chip_gen: v5e
topology: v5e:2x2
jax: 0.10.0
libtpu: 0.0.40
codegen_flags: <defaults>
</compile_context>

<pallas_src>
import functools

import jax
import jax.numpy as jnp
from jax.experimental import pallas as pl
from jax.experimental.pallas import tpu as pltpu


def _round_up(x, m):
    return (x + m - 1) // m * m


def _chip_info():
    """(is_v5e, physical per-core VMEM bytes, default scoped VMEM limit)."""
    kind = ""
    try:
        kind = jax.devices()[0].device_kind.lower()
    except Exception:
        pass
    is_v5e = "v5" in kind                      # v5e / "v5 lite" (v5p treated conservatively)
    try:
        vmem_phys = int(pltpu.get_tpu_info().vmem_capacity_bytes)
    except Exception:
        vmem_phys = 64 * 1024 * 1024           # conservative fallback (v7x per-TC size)
    default_scoped = (16 if is_v5e else 32) * 1024 * 1024
    return is_v5e, vmem_phys, default_scoped


def _padded_dims(in_f, hid_f, out_f, is_v5e):
    """Lane-dense padded dims + hidden-chunk size (zero padding keeps the math exact)."""
    in_p = _round_up(in_f, 128)
    out_p = _round_up(out_f, 128)
    tk_target = 256 if is_v5e else 512         # multiple of 256 for v6e/v7x MXU tiles
    hid_128 = _round_up(hid_f, 128)
    if hid_128 <= tk_target:
        tk, hid_p = hid_128, hid_128
    else:
        tk = tk_target
        hid_p = _round_up(hid_f, tk)           # pad so tk divides HID_p exactly
    return in_p, hid_p, out_p, tk, hid_p // tk


def _pad_cast(a, shape, dtype):
    """Zero-pad + cast; a no-op when the operand is already in the target layout."""
    if a.shape == shape and a.dtype == jnp.dtype(dtype):
        return a
    out = jnp.zeros(shape, dtype)
    return out.at[tuple(slice(0, s) for s in a.shape)].set(a.astype(dtype))


def _bspec(shape, index_map, mode=None):
    if mode is None:
        return pl.BlockSpec(shape, index_map)
    return pl.BlockSpec(shape, index_map, pipeline_mode=mode)


# --------------------------------------------------------------------------
# Kernels
# --------------------------------------------------------------------------
def _mlp_resident_kernel(x_ref, w1_ref, b1_ref, w2_ref, b2_ref, o_ref, acc_ref,
                         *, tk, n_chunks):
    """Weights VMEM-resident.  Hidden dim processed in chunks of tk so the f32
    activation never exceeds (tm, tk); fc2 partials accumulate in VMEM scratch."""
    x = x_ref[...].astype(jnp.bfloat16)            # f32 -> bf16 cast in-kernel (VPU)
    if n_chunks == 1:
        h = jnp.dot(x, w1_ref[...], preferred_element_type=jnp.float32)
        h = jnp.maximum(h + b1_ref[...], 0.0)
        out = jnp.dot(h.astype(jnp.bfloat16), w2_ref[...],
                      preferred_element_type=jnp.float32)
        o_ref[...] = (out + b2_ref[...]).astype(o_ref.dtype)
    else:
        acc_ref[...] = jnp.zeros_like(acc_ref)

        @pl.loop(0, n_chunks)
        def _(c):
            k0 = pl.multiple_of(c * tk, tk)
            h = jnp.dot(x, w1_ref[:, pl.ds(k0, tk)],
                        preferred_element_type=jnp.float32)
            h = jnp.maximum(h + b1_ref[:, pl.ds(k0, tk)], 0.0)
            acc_ref[...] += jnp.dot(h.astype(jnp.bfloat16),
                                    w2_ref[pl.ds(k0, tk), :],
                                    preferred_element_type=jnp.float32)

        o_ref[...] = (acc_ref[...] + b2_ref[...]).astype(o_ref.dtype)


def _mlp_stream_kernel(x_ref, w1_ref, b1_ref, w2_ref, b2_ref, o_ref, acc_ref):
    """Weights streamed per hidden chunk over a trailing "arbitrary" grid axis;
    fc2 partials accumulate into a (tm, OUT_p) f32 VMEM scratch."""
    k = pl.program_id(1)

    @pl.when(k == 0)
    def _():
        acc_ref[...] = jnp.zeros_like(acc_ref)

    x = x_ref[...].astype(jnp.bfloat16)
    h = jnp.dot(x, w1_ref[...], preferred_element_type=jnp.float32)
    h = jnp.maximum(h + b1_ref[...], 0.0)
    acc_ref[...] += jnp.dot(h.astype(jnp.bfloat16), w2_ref[...],
                            preferred_element_type=jnp.float32)

    @pl.when(k == pl.num_programs(1) - 1)
    def _():
        o_ref[...] = (acc_ref[...] + b2_ref[...]).astype(o_ref.dtype)


# --------------------------------------------------------------------------
# Wrapper
# --------------------------------------------------------------------------
def prepare_mlp_params(w1, b1, w2, b2):
    """Pad + cast parameters once (at init) to the lane-dense bf16/f32 layout.
    mlp_forward detects prepared params and skips the per-call pad/cast pass."""
    is_v5e, _, _ = _chip_info()
    in_f, hid_f = w1.shape
    out_f = w2.shape[1]
    in_p, hid_p, out_p, _, _ = _padded_dims(in_f, hid_f, out_f, is_v5e)
    return (_pad_cast(w1, (in_p, hid_p), jnp.bfloat16),
            _pad_cast(b1.reshape(1, -1), (1, hid_p), jnp.float32),
            _pad_cast(w2, (hid_p, out_p), jnp.bfloat16),
            _pad_cast(b2.reshape(1, -1), (1, out_p), jnp.float32))


def mlp_forward(x, w1, b1, w2, b2, *, out_features=None, block_b=None):
    """MLP forward: ReLU(x @ w1 + b1) @ w2 + b2.

    x: [B, IN] f32; w1: [IN, HID]; b1: [1, HID]; w2: [HID, OUT]; b2: [1, OUT]
    (raw f32 or pre-prepared via prepare_mlp_params).  Returns [B, OUT] f32.
    Pass out_features= when using prepared (padded) params.
    """
    is_v5e, vmem_phys, default_scoped = _chip_info()

    B, in_f = x.shape
    hid_f = w1.shape[1]
    out_f = w2.shape[1]
    out_features = out_f if out_features is None else out_features

    in_p, hid_p, out_p, tk, n_chunks = _padded_dims(in_f, hid_f, out_f, is_v5e)

    # Batch tile: v5e MXU is 4x128x128 -> tm=128 fills it; v6e/v7x are 2x256x256
    # -> tm=256.  Small batches round to a multiple of 16 (bf16 sublane packing).
    tm_target = block_b if block_b is not None else (128 if is_v5e else 256)
    if B <= tm_target:
        tm = max(16, _round_up(B, 16))
        B_p = tm
    else:
        tm = tm_target
        B_p = _round_up(B, tm)
    grid_b = B_p // tm

    # Pad/cast operands; skipped when already lane-dense (e.g. prepared params).
    # x stays f32 — the kernel casts to bf16, saving a full HBM write+read pass.
    x_p = _pad_cast(x, (B_p, in_p), x.dtype)
    w1_p = _pad_cast(w1, (in_p, hid_p), jnp.bfloat16)
    b1_p = _pad_cast(b1.reshape(1, -1), (1, hid_p), jnp.float32)
    w2_p = _pad_cast(w2, (hid_p, out_p), jnp.bfloat16)
    b2_p = _pad_cast(b2.reshape(1, -1), (1, out_p), jnp.float32)

    # ---- Per-core VMEM budget (v7x: each TC holds its own copy under the
    # "parallel" batch split, and vmem_phys from get_tpu_info() is per-core). ----
    headroom = 2 * 1024 * 1024
    w_bytes = (in_p * hid_p + hid_p * out_p) * 2           # bf16, single-buffered
    bias_bytes = (hid_p + out_p) * 4
    x_tile = tm * in_p * int(jnp.dtype(x_p.dtype).itemsize)
    o_tile = tm * out_p * 4
    chunk_scratch = tm * out_p * 4 + tm * tk * 6           # f32 acc + f32/bf16 h chunk
    x_buffers = 3 if grid_b > 2 else 2                     # extra buffer hides x DMA

    resident_need = (w_bytes + bias_bytes + x_buffers * x_tile + 2 * o_tile
                     + chunk_scratch + headroom)
    resident = resident_need <= vmem_phys * 3 // 4

    if resident:
        vmem_need = resident_need
    else:
        vmem_need = (2 * (in_p * tk + tk * out_p) * 2 + 2 * (tk + out_p) * 4
                     + 2 * x_tile + 2 * o_tile + chunk_scratch + headroom)

    vmem_limit = None
    if vmem_need > default_scoped - (1 << 20):
        vmem_limit = int(min(max(vmem_need * 5 // 4, default_scoped),
                             vmem_phys * 9 // 10))

    # ---- Cost estimate (advisory, lets XLA schedule around the custom call). ----
    flops = 2 * B_p * in_p * hid_p + 2 * B_p * hid_p * out_p
    bytes_accessed = int(x_p.size * jnp.dtype(x_p.dtype).itemsize
                         + w_bytes + bias_bytes + B_p * out_p * 4)
    cost = pl.CostEstimate(flops=int(flops), transcendentals=0,
                           bytes_accessed=bytes_accessed)

    out_shape = jax.ShapeDtypeStruct((B_p, out_p), jnp.float32)

    if resident:
        x_mode = pl.Buffered(3) if x_buffers == 3 else None
        res_mode = pl.Buffered(1)    # constant-index blocks: no double buffering
        kernel = functools.partial(_mlp_resident_kernel, tk=tk, n_chunks=n_chunks)
        out_padded = pl.pallas_call(
            kernel,
            out_shape=out_shape,
            grid_spec=pltpu.PrefetchScalarGridSpec(
                num_scalar_prefetch=0,
                grid=(grid_b,),
                in_specs=[
                    _bspec((tm, in_p), lambda i: (i, 0), x_mode),
                    _bspec((in_p, hid_p), lambda i: (0, 0), res_mode),
                    _bspec((1, hid_p), lambda i: (0, 0), res_mode),
                    _bspec((hid_p, out_p), lambda i: (0, 0), res_mode),
                    _bspec((1, out_p), lambda i: (0, 0), res_mode),
                ],
                out_specs=pl.BlockSpec((tm, out_p), lambda i: (i, 0)),
                scratch_shapes=[pltpu.VMEM((tm, out_p), jnp.float32)],
            ),
            compiler_params=pltpu.CompilerParams(
                dimension_semantics=("parallel",),
                vmem_limit_bytes=vmem_limit,
            ),
            cost_estimate=cost,
        )(x_p, w1_p, b1_p, w2_p, b2_p)
    else:
        # Streaming path: hidden chunks on a trailing "arbitrary" grid axis.
        # TODO(synk): also chunk IN/OUT if a single (IN_p, tk)/(tk, OUT_p) block
        # ever exceeds the per-core VMEM budget.
        out_padded = pl.pallas_call(
            _mlp_stream_kernel,
            out_shape=out_shape,
            grid_spec=pltpu.PrefetchScalarGridSpec(
                num_scalar_prefetch=0,
                grid=(grid_b, n_chunks),
                in_specs=[
                    pl.BlockSpec((tm, in_p), lambda i, k: (i, 0)),
                    pl.BlockSpec((in_p, tk), lambda i, k: (0, k)),
                    pl.BlockSpec((1, tk), lambda i, k: (0, k)),
                    pl.BlockSpec((tk, out_p), lambda i, k: (k, 0)),
                    pl.BlockSpec((1, out_p), lambda i, k: (0, 0)),
                ],
                out_specs=pl.BlockSpec((tm, out_p), lambda i, k: (i, 0)),
                scratch_shapes=[pltpu.VMEM((tm, out_p), jnp.float32)],
            ),
            compiler_params=pltpu.CompilerParams(
                dimension_semantics=("parallel", "arbitrary"),
                vmem_limit_bytes=vmem_limit,
            ),
            cost_estimate=cost,
        )(x_p, w1_p, b1_p, w2_p, b2_p)

    return out_padded[:B, :out_features]


def init_mlp_params(key, input_size, hidden_size, output_size, dtype=jnp.float32):
    """Deterministic init mimicking nn.Linear's uniform(-1/sqrt(fan_in), 1/sqrt(fan_in))."""
    k1, k2, k3, k4 = jax.random.split(key, 4)
    bound1 = 1.0 / jnp.sqrt(input_size)
    bound2 = 1.0 / jnp.sqrt(hidden_size)
    # stored transposed relative to PyTorch ([out, in] -> [in, out])
    w1 = jax.random.uniform(k1, (input_size, hidden_size), dtype, -bound1, bound1)
    b1 = jax.random.uniform(k2, (1, hidden_size), dtype, -bound1, bound1)
    w2 = jax.random.uniform(k3, (hidden_size, output_size), dtype, -bound2, bound2)
    b2 = jax.random.uniform(k4, (1, output_size), dtype, -bound2, bound2)
    return w1, b1, w2, b2


if __name__ == "__main__":
    # Small shapes consistent with the module's forward:
    # batch=8, input_size=32, hidden_size=64, output_size=16
    B, IN, HID, OUT = 8, 32, 64, 16

    key = jax.random.PRNGKey(0)
    kx, kp = jax.random.split(key)
    x = jax.random.normal(kx, (B, IN), jnp.float32)
    w1, b1, w2, b2 = init_mlp_params(kp, IN, HID, OUT)

    out = mlp_forward(x, w1, b1, w2, b2)
    jax.block_until_ready(out)

    # Pure-JAX f32 reference (same math as PyTorch fc1 -> ReLU -> fc2).
    # bf16 MXU matmuls slightly loosen tolerance vs the pure-f32 reference.
    ref = jnp.maximum(x @ w1 + b1, 0.0) @ w2 + b2
    assert out.shape == (B, OUT)
    assert jnp.allclose(out, ref, atol=2e-2, rtol=2e-2), \
        float(jnp.max(jnp.abs(out - ref)))

    print("KERNEL_OK")
</pallas_src>

<mosaic_0001>
module attributes {stable_mosaic.version = 11 : i64} {
  func.func @_mlp_resident_kernel(%arg0: i32, %arg1: memref<16x128xf32, #tpu.memory_space<vmem>>, %arg2: memref<128x128xbf16, #tpu.memory_space<vmem>>, %arg3: memref<1x128xf32, #tpu.memory_space<vmem>>, %arg4: memref<128x128xbf16, #tpu.memory_space<vmem>>, %arg5: memref<1x128xf32, #tpu.memory_space<vmem>>, %arg6: memref<16x128xf32, #tpu.memory_space<vmem>>, %arg7: memref<16x128xf32, #tpu.memory_space<vmem>>) attributes {dimension_semantics = [#tpu.dimension_semantics<parallel>], iteration_bounds = array<i64: 1>, scalar_prefetch = 0 : i64, scratch_operands = 1 : i64, tpu.core_type = #tpu.core_type<tc>, window_params = [{transform_indices = @transform_0, window_bounds = array<i64: 16, 128>}, {pipeline_mode = #tpu.pipeline_mode<synchronous>, transform_indices = @transform_1, window_bounds = array<i64: 128, 128>}, {pipeline_mode = #tpu.pipeline_mode<synchronous>, transform_indices = @transform_2, window_bounds = array<i64: 1, 128>}, {pipeline_mode = #tpu.pipeline_mode<synchronous>, transform_indices = @transform_3, window_bounds = array<i64: 128, 128>}, {pipeline_mode = #tpu.pipeline_mode<synchronous>, transform_indices = @transform_4, window_bounds = array<i64: 1, 128>}, {transform_indices = @transform_5, window_bounds = array<i64: 16, 128>}]} {
    %c0 = arith.constant 0 : index
    %c0_0 = arith.constant 0 : index
    %0 = vector.load %arg1[%c0, %c0_0] : memref<16x128xf32, #tpu.memory_space<vmem>>, vector<16x128xf32>
    %1 = arith.truncf %0 : vector<16x128xf32> to vector<16x128xbf16>
    %c0_1 = arith.constant 0 : index
    %c0_2 = arith.constant 0 : index
    %2 = vector.load %arg2[%c0_1, %c0_2] : memref<128x128xbf16, #tpu.memory_space<vmem>>, vector<128x128xbf16>
    %cst = arith.constant dense<0.000000e+00> : vector<16x128xf32>
    %3 = tpu.matmul %1, %2, %cst {dimension_numbers = #tpu.dot_dimension_numbers<[1], [0], [0], [1], [0, 0, 1, 1], [], []>} : vector<16x128xbf16>, vector<128x128xbf16>, vector<16x128xf32> -> vector<16x128xf32>
    %c0_3 = arith.constant 0 : index
    %c0_4 = arith.constant 0 : index
    %4 = vector.load %arg3[%c0_3, %c0_4] : memref<1x128xf32, #tpu.memory_space<vmem>>, vector<1x128xf32>
    %5 = vector.broadcast %4 : vector<1x128xf32> to vector<16x128xf32>
    %6 = arith.addf %3, %5 : vector<16x128xf32>
    %cst_5 = arith.constant 0.000000e+00 : f32
    %7 = vector.broadcast %cst_5 : f32 to vector<16x128xf32>
    %8 = arith.maximumf %6, %7 : vector<16x128xf32>
    %9 = arith.truncf %8 : vector<16x128xf32> to vector<16x128xbf16>
    %c0_6 = arith.constant 0 : index
    %c0_7 = arith.constant 0 : index
    %10 = vector.load %arg4[%c0_6, %c0_7] : memref<128x128xbf16, #tpu.memory_space<vmem>>, vector<128x128xbf16>
    %cst_8 = arith.constant dense<0.000000e+00> : vector<16x128xf32>
    %11 = tpu.matmul %9, %10, %cst_8 {dimension_numbers = #tpu.dot_dimension_numbers<[1], [0], [0], [1], [0, 0, 1, 1], [], []>} : vector<16x128xbf16>, vector<128x128xbf16>, vector<16x128xf32> -> vector<16x128xf32>
    %c0_9 = arith.constant 0 : index
    %c0_10 = arith.constant 0 : index
    %12 = vector.load %arg5[%c0_9, %c0_10] : memref<1x128xf32, #tpu.memory_space<vmem>>, vector<1x128xf32>
    %13 = vector.broadcast %12 : vector<1x128xf32> to vector<16x128xf32>
    %14 = arith.addf %11, %13 : vector<16x128xf32>
    %c0_11 = arith.constant 0 : index
    %c0_12 = arith.constant 0 : index
    %15 = vector.load %arg6[%c0_11, %c0_12] : memref<16x128xf32, #tpu.memory_space<vmem>>, vector<16x128xf32>
    tpu.vector_store %arg6[%c0_11, %c0_12], %14 {strides = array<i32>} : memref<16x128xf32, #tpu.memory_space<vmem>>, vector<16x128xf32>,
    return
  }
  func.func @transform_0(%arg0: i32) -> (i32, i32) {
    %c0_i32 = arith.constant 0 : i32
    %c0_i32_0 = arith.constant 0 : i32
    return %arg0, %c0_i32 : i32, i32
  }
  func.func @transform_1(%arg0: i32) -> (i32, i32) {
    %c0_i32 = arith.constant 0 : i32
    %c0_i32_0 = arith.constant 0 : i32
    %c0_i32_1 = arith.constant 0 : i32
    return %c0_i32, %c0_i32_0 : i32, i32
  }
  func.func @transform_2(%arg0: i32) -> (i32, i32) {
    %c0_i32 = arith.constant 0 : i32
    %c0_i32_0 = arith.constant 0 : i32
    %c0_i32_1 = arith.constant 0 : i32
    return %c0_i32, %c0_i32_0 : i32, i32
  }
  func.func @transform_3(%arg0: i32) -> (i32, i32) {
    %c0_i32 = arith.constant 0 : i32
    %c0_i32_0 = arith.constant 0 : i32
    %c0_i32_1 = arith.constant 0 : i32
    return %c0_i32, %c0_i32_0 : i32, i32
  }
  func.func @transform_4(%arg0: i32) -> (i32, i32) {
    %c0_i32 = arith.constant 0 : i32
    %c0_i32_0 = arith.constant 0 : i32
    %c0_i32_1 = arith.constant 0 : i32
    return %c0_i32, %c0_i32_0 : i32, i32
  }
  func.func @transform_5(%arg0: i32) -> (i32, i32) {
    %c0_i32 = arith.constant 0 : i32
    %c0_i32_0 = arith.constant 0 : i32
    return %arg0, %c0_i32 : i32, i32
  }
}

</mosaic_0001>

<bundles_post_ra>
// kernel: tpu_custom_call.1
= control target key start
LH: loop header
LB: loop body
LE: loop exit
PB: predicated region body
PF: predicated region fallthrough
CT: control target
= control target key end

     0   :  { %10 = vsyncpa [#allocation4], 0  ;;  %s514_s0 = inlined_call_operand.hbm [shape: f32[16,128], index: 0, kind: input, shape index: {}]   ;;  %s515_s1 = inlined_call_operand.hbm [shape: bf16[128,128], index: 1, kind: input, shape index: {}]   ;;  %s516_s2 = inlined_call_operand.vmem [shape: f32[1,128], index: 2, kind: input, shape index: {}]   ;;  %s517_s3 = inlined_call_operand.hbm [shape: bf16[128,128], index: 3, kind: input, shape index: {}]   ;;  %s518_s4 = inlined_call_operand.vmem [shape: f32[1,128], index: 4, kind: input, shape index: {}]   ;;  %s519_s5 = inlined_call_operand.hbm [shape: f32[16,128], index: 5, kind: output, shape index: {}]  }
   0x1   :  { %11 = vsyncpa [#allocation7], 0  ;;  %s30_s20 = sshll.u32 %s515_s1, 4  ;;  %s31_s20 = int_to_ptr.hbm [resolvable:$true] %s30_s20 }
   0x2   :  { %12 = vsyncpa [#allocation5], 0  ;;  %s452_s21 = smov [#allocation6]   ;;  %s17_s25 = sshll.u32 %s514_s0, 4  ;;  %s18_s25 = int_to_ptr.hbm [resolvable:$true] %s17_s25 }
   0x3   :  { %s32_s22 = sshll.u32 %s452_s21, 4  ;;  %s453_s26 = smov 64   ;;  %s33_s22 = int_to_ptr.vmem [resolvable:$true] %s32_s22 }
   0x4   :  { %s454_s27 = smov 4   ;;  %s455_s28 = smov [#allocation3]  }
   0x5   :  { %38 = dma.hbm_to_vmem [thread:$0]  %s31_s20, 1024, %s33_s22, [#allocation7], %s453_s26, %s453_s26, %s454_s27  }
   0x6   :  { %s19_s29 = sshll.u32 %s455_s28, 4  ;;  %s456_s30 = smov 128   ;;  %s20_s29 = int_to_ptr.vmem [resolvable:$true] %s19_s29 }
   0x7   :  { %s457_s6 = smov 8   ;;  %s45_s8 = sshll.u32 %s517_s3, 4  ;;  %s46_s8 = int_to_ptr.hbm [resolvable:$true] %s45_s8 }
   0x8   :  { %25 = dma.hbm_to_vmem [thread:$0]  %s18_s25, 256, %s20_s29, [#allocation4], %s456_s30, %s456_s30, %s457_s6  }
   0x9   :  { %s458_s9 = smov [#allocation8]  }
   0xa   :  { %s47_s0 = sshll.u32 %s458_s9, 4  ;;  %s48_s0 = int_to_ptr.vmem [resolvable:$true] %s47_s0 }
   0xb   :  { %53 = dma.hbm_to_vmem [thread:$0]  %s46_s8, 1024, %s48_s0, [#allocation7], %s453_s26, %s453_s26, %s454_s27  }
   0xc   :  { %446 = dma.done.wait [#allocation4], 256  }
   0xd   :  { %447 = vsyncadd [#allocation4], 4294967040 }
   0xe   :  { %448 = dma.done.wait [#allocation7], 2048  }
   0xf   :  { %449 = vsyncadd [#allocation7], 4294965248  ;;  %v331_v0 = vld [vmem:[#allocation6 + $0x38] sm:$0xff]  ;;  %v330_v1 = vld [vmem:[#allocation6 + $0x30] sm:$0xff]  ;;  %s459_s13 = smov [#allocation9]  }
  0x10   :  { %139 = vmatpush.bf16.msra.mxu0 %v331_v0  ;;  %v339_v2 = vld [vmem:[#allocation8 + $0x38] sm:$0xff]  ;;  %v338_v3 = vld [vmem:[#allocation8 + $0x30] sm:$0xff]  ;;  %v329_v4 = vld [vmem:[#allocation6 + $0x28] sm:$0xff]  ;;  %s244_s14 = sshll.u32 %s459_s13, 4  ;;  %s245_s14 = int_to_ptr.vmem [resolvable:$true] %s244_s14 }
  0x11   :  { %224 = vmatpush.bf16.msra.mxu1 %v339_v2  ;;  %v337_v5 = vld [vmem:[#allocation8 + $0x28] sm:$0xff]  ;;  %v328_v6 = vld [vmem:[#allocation6 + $0x20] sm:$0xff]  ;;  %v327_v8 = vld [vmem:[#allocation6 + $0x18] sm:$0xff] }
  0x12   :  { %v336_v7 = vld [vmem:[#allocation8 + $0x20] sm:$0xff]  ;;  %v326_v9 = vld [vmem:[#allocation6 + $0x10] sm:$0xff]  ;;  %v325_v10 = vld [vmem:[#allocation6 + $0x8] sm:$0xff] }
  0x13   :  { %v324_v11 = vld [vmem:[#allocation6] sm:$0xff]  ;;  %v68_v12 = vld [vmem:[#allocation3] sm:$0xff]  ;;  %v69_v13 = vld [vmem:[#allocation3 + $0x8] sm:$0xff] }
  0x14   :  { %140 = vmatpush.bf16.msra.mxu0 %v330_v1  ;;  %v70_v14 = vpack.c.bf16 %v69_v13, %v68_v12  ;;  %v335_v15 = vld [vmem:[#allocation8 + $0x18] sm:$0xff]  ;;  %v334_v16 = vld [vmem:[#allocation8 + $0x10] sm:$0xff]  ;;  %v333_v17 = vld [vmem:[#allocation8 + $0x8] sm:$0xff] }
  0x15   :  { %225 = vmatpush.bf16.msra.mxu1 %v338_v3  ;;  %v332_v18 = vld [vmem:[#allocation8] sm:$0xff]  ;;  %v348_v20 = vld [vmem:[%s516_s2] ss:$0 sm:$0xff]  ;;  %s246_s2 = sshll.u32 %s519_s5, 4  ;;  %s247_s2 = int_to_ptr.hbm [resolvable:$true] %s246_s2 }
  0x16   :  { %v349_v27 = vld [vmem:[%s518_s4] ss:$0 sm:$0xff] }
  0x18   :  { %141 = vmatpush.bf16.msra.mxu0 %v329_v4 }
  0x19   :  { %226 = vmatpush.bf16.msra.mxu1 %v337_v5 }
  0x1c   :  { %142 = vmatpush.bf16.msra.mxu0 %v328_v6 }
  0x1d   :  { %227 = vmatpush.bf16.msra.mxu1 %v336_v7 }
  0x20   :  { %143 = vmatpush.bf16.msra.mxu0 %v327_v8 }
  0x21   :  { %228 = vmatpush.bf16.msra.mxu1 %v335_v15 }
  0x24   :  { %144 = vmatpush.bf16.msra.mxu0 %v326_v9 }
  0x25   :  { %229 = vmatpush.bf16.msra.mxu1 %v334_v16 }
  0x28   :  { %145 = vmatpush.bf16.msra.mxu0 %v325_v10 }
  0x29   :  { %230 = vmatpush.bf16.msra.mxu1 %v333_v17 }
  0x2c   :  { %146 = vmatpush.bf16.msra.mxu0 %v324_v11 }
  0x2d   :  { %231 = vmatpush.bf16.msra.mxu1 %v332_v18 }
  0x2f   :  { %147 = vmatmul.bf16.vlgmr.msra.gmra.mxu0 %v70_v14 }
  0xac   :  { %v148_v19 = vpop.f32.mrf.mxu0 }
  0xad   :  { %v149_v21 = vadd.f32 %v348_v20, %v148_v19 }
  0xaf   :  { %v153_v24 = vmax.f32 %v149_v21, 0.0 }
  0xb4   :  { %v150_v22 = vpop.f32.mrf.mxu0 }
  0xb5   :  { %v151_v23 = vadd.f32 %v348_v20, %v150_v22 }
  0xb7   :  { %v154_v25 = vmax.f32 %v151_v23, 0.0 }
  0xb9   :  { %v155_v26 = vpack.c.bf16 %v154_v25, %v153_v24 }
  0xbb   :  { %232 = vmatmul.bf16.vlgmr.msra.gmra.mxu1 %v155_v26 }
 0x138   :  { %v233_v28 = vpop.f32.mrf.mxu1 }
 0x139   :  { %v234_v29 = vadd.f32 %v349_v27, %v233_v28 }
 0x13b   :  { %238 = vst [vmem:[#allocation9] sm:$0xff] %v234_v29 }
 0x140   :  { %v235_v30 = vpop.f32.mrf.mxu1 }
 0x141   :  { %v236_v31 = vadd.f32 %v349_v27, %v235_v30 }
 0x143   :  { %239 = vst [vmem:[#allocation9 + $0x8] sm:$0xff] %v236_v31 }
 0x144   :  { %252 = dma.vmem_to_hbm [thread:$0]  %s245_s14, 256, %s247_s2, [#allocation5], %s456_s30, %s456_s30, %s457_s6  }
 0x145   :  { %450 = dma.done.wait [#allocation5], 256  }
 0x146   :  { %451 = vsyncadd [#allocation5], 4294967040 }
 0x147   :  { %257 = vsyncpa [#allocation4], 1 }
 0x148   :  { %258 = vsyncpa [#allocation7], 1 }
 0x149   :  { %259 = vsyncpa [#allocation5], 1 }

</bundles_post_ra>
